<compile_context>
chip_gen: v5e
topology: v5e:2x2
jax: 0.10.0
libtpu: 0.0.40
codegen_flags: <defaults>
</compile_context>

<pallas_src>
import functools

import jax
import jax.numpy as jnp
from jax.experimental import pallas as pl
from jax.experimental.pallas import tpu as pltpu

LN_EPS = 1e-5


def _round_up(x, m):
    return ((x + m - 1) // m) * m


def _pad2(a, rows, cols):
    return jnp.pad(a, ((0, rows - a.shape[0]), (0, cols - a.shape[1])))


# ---------------- fused kernel (whole MLP in one pallas_call) ------------------------
def _make_fused_kernel(num_layers, norm_type, true_out_dims):
    """true_out_dims[l] = un-padded output width of layer l (LN divisor)."""

    def kernel(x_ref, *refs):
        o_ref = refs[-1]
        prefs = refs[:-1]
        h = x_ref[...]            # (tile_b, Din_pad) f32; padded cols are zero
        idx = 0
        for l in range(num_layers):
            w = prefs[idx][...]
            b = prefs[idx + 1][...]
            idx += 2
            h = jnp.dot(h, w, preferred_element_type=jnp.float32) + b
            if l != num_layers - 1:
                # dropout (eval) -> identity, then ReLU
                h = jnp.maximum(h, 0.0)
                if norm_type == "ln":
                    g = prefs[idx][...]
                    beta = prefs[idx + 1][...]
                    idx += 2
                    d = float(true_out_dims[l])
                    # one-pass mean/var over the TRUE width (padded cols are 0)
                    mean = jnp.sum(h, axis=-1, keepdims=True) / d
                    ex2 = jnp.sum(h * h, axis=-1, keepdims=True) / d
                    var = ex2 - mean * mean
                    h = (h - mean) * jax.lax.rsqrt(var + LN_EPS)
                    # gamma/beta are zero in padded cols -> padded cols stay 0
                    h = h * g + beta
        o_ref[...] = h.astype(o_ref.dtype)

    return kernel


# ---------------- wrapper ------------------------------------------------------------
@functools.partial(jax.jit, static_argnames=("norm_type", "tile_b"))
def mlp_forward(feats, params, norm_type="ln", tile_b=None):
    """params: list of dicts per layer: {'w': (in,out), 'b': (1,out),
    optionally 'g': (1,out), 'beta': (1,out)} — last layer has no norm."""
    if norm_type == "bn":
        # TODO(synk): BatchNorm1d (running stats) path not implemented in Pallas.
        raise NotImplementedError("norm_type='bn' is not implemented")
    if norm_type not in ("ln", "none"):
        raise ValueError(f"unknown norm_type: {norm_type!r}")

    num_layers = len(params)
    B, din = feats.shape
    dims = [din] + [p["w"].shape[1] for p in params]        # true widths
    pdims = [_round_up(d, 128) for d in dims]                # lane-dense widths

    # batch tiling: small batches -> one tile; large batches -> big tiles (<=512)
    if tile_b is None:
        tile_b = min(512, _round_up(B, 8))
    bp = _round_up(B, tile_b)
    n_tiles = bp // tile_b

    x = _pad2(feats.astype(jnp.float32), bp, pdims[0])

    # flatten + zero-pad parameters (zero pad keeps padded activations exactly 0)
    flat = []
    for l, p in enumerate(params):
        din_p, dout_p = pdims[l], pdims[l + 1]
        flat.append(_pad2(p["w"].astype(jnp.float32), din_p, dout_p))
        flat.append(_pad2(p["b"].astype(jnp.float32), 1, dout_p))
        if l != num_layers - 1 and norm_type == "ln":
            flat.append(_pad2(p["g"].astype(jnp.float32), 1, dout_p))
            flat.append(_pad2(p["beta"].astype(jnp.float32), 1, dout_p))

    kernel = _make_fused_kernel(num_layers, norm_type, dims[1:])

    # BlockSpecs: x/out walk the batch grid, params are grid-invariant (resident)
    in_specs = [pl.BlockSpec((tile_b, pdims[0]), lambda i: (i, 0))]
    for arr in flat:
        in_specs.append(pl.BlockSpec(arr.shape, lambda i: (0, 0)))
    out_specs = pl.BlockSpec((tile_b, pdims[-1]), lambda i: (i, 0))

    # cost estimate (helps XLA schedule around the custom call)
    flops = 2 * bp * sum(pdims[l] * pdims[l + 1] for l in range(num_layers))
    transcendentals = bp * max(num_layers - 1, 0)            # one rsqrt / row / LN
    bytes_accessed = 4 * (x.size + sum(a.size for a in flat) + bp * pdims[-1])
    cost = pl.CostEstimate(flops=flops, transcendentals=transcendentals,
                           bytes_accessed=bytes_accessed)

    # scoped VMEM: resident weights + double-buffered x/out tiles
    resident_bytes = 4 * sum(a.size for a in flat)
    tile_bytes = 4 * 2 * (tile_b * pdims[0] + tile_b * pdims[-1])
    cp_kwargs = dict(dimension_semantics=("parallel",))
    need = resident_bytes + tile_bytes
    if need > 12 * 1024 * 1024:          # v5e default scoped limit is only 16 MiB
        cp_kwargs["vmem_limit_bytes"] = min(int(need * 1.5) + (1 << 20), 96 << 20)

    out = pl.pallas_call(
        kernel,
        out_shape=jax.ShapeDtypeStruct((bp, pdims[-1]), jnp.float32),
        grid=(n_tiles,),
        in_specs=in_specs,
        out_specs=out_specs,
        cost_estimate=cost,
        compiler_params=pltpu.CompilerParams(**cp_kwargs),
    )(x, *flat)

    return out[:B, :dims[-1]]


# ---------------- pure-JAX reference for correctness check --------------------------
def mlp_reference(feats, params, norm_type="ln"):
    h = feats
    n_layers = len(params)
    for l, p in enumerate(params):
        h = h @ p["w"] + p["b"]
        if l != n_layers - 1:
            h = jnp.maximum(h, 0.0)  # dropout (eval) -> identity, then relu
            if norm_type == "ln":
                mean = jnp.mean(h, axis=-1, keepdims=True)
                var = jnp.mean((h - mean) ** 2, axis=-1, keepdims=True)
                h = (h - mean) / jnp.sqrt(var + LN_EPS) * p["g"] + p["beta"]
    return h


# ---------------- deterministic param init ------------------------------------------
def init_params(key, input_dim, hidden_dim, output_dim, num_layers, norm_type="ln"):
    dims = ([(input_dim, output_dim)] if num_layers == 1 else
            [(input_dim, hidden_dim)]
            + [(hidden_dim, hidden_dim)] * (num_layers - 2)
            + [(hidden_dim, output_dim)])
    params = []
    for l, (din, dout) in enumerate(dims):
        key, kw, kb = jax.random.split(key, 3)
        bound = 1.0 / jnp.sqrt(din)
        p = {
            "w": jax.random.uniform(kw, (din, dout), jnp.float32, -bound, bound),
            "b": jax.random.uniform(kb, (1, dout), jnp.float32, -bound, bound),
        }
        if l != len(dims) - 1 and norm_type == "ln":
            p["g"] = jnp.ones((1, dout), jnp.float32)
            p["beta"] = jnp.zeros((1, dout), jnp.float32)
        params.append(p)
    return params


if __name__ == "__main__":
    # small shapes consistent with the module
    batch, input_dim, hidden_dim, output_dim, num_layers = 8, 32, 64, 16, 3
    norm_type = "ln"   # TODO(synk): 'bn' (BatchNorm1d running stats) not implemented

    key = jax.random.PRNGKey(0)
    key, kx = jax.random.split(key)
    feats = jax.random.normal(kx, (batch, input_dim), jnp.float32)

    params = init_params(key, input_dim, hidden_dim, output_dim, num_layers, norm_type)

    out = mlp_forward(feats, params, norm_type=norm_type)
    out = jax.block_until_ready(out)

    ref = mlp_reference(feats, params, norm_type)
    assert out.shape == (batch, output_dim)
    assert jnp.allclose(out, ref, atol=1e-4, rtol=1e-4)
    print("KERNEL_OK")
</pallas_src>

<mosaic_0001>
module attributes {stable_mosaic.version = 11 : i64} {
  func.func @kernel(%arg0: i32, %arg1: memref<8x128xf32, #tpu.memory_space<vmem>>, %arg2: memref<128x128xf32, #tpu.memory_space<vmem>>, %arg3: memref<1x128xf32, #tpu.memory_space<vmem>>, %arg4: memref<1x128xf32, #tpu.memory_space<vmem>>, %arg5: memref<1x128xf32, #tpu.memory_space<vmem>>, %arg6: memref<128x128xf32, #tpu.memory_space<vmem>>, %arg7: memref<1x128xf32, #tpu.memory_space<vmem>>, %arg8: memref<1x128xf32, #tpu.memory_space<vmem>>, %arg9: memref<1x128xf32, #tpu.memory_space<vmem>>, %arg10: memref<128x128xf32, #tpu.memory_space<vmem>>, %arg11: memref<1x128xf32, #tpu.memory_space<vmem>>, %arg12: memref<8x128xf32, #tpu.memory_space<vmem>>) attributes {dimension_semantics = [#tpu.dimension_semantics<parallel>], iteration_bounds = array<i64: 1>, scalar_prefetch = 0 : i64, scratch_operands = 0 : i64, tpu.core_type = #tpu.core_type<tc>, window_params = [{transform_indices = @transform_0, window_bounds = array<i64: 8, 128>}, {pipeline_mode = #tpu.pipeline_mode<synchronous>, transform_indices = @transform_1, window_bounds = array<i64: 128, 128>}, {pipeline_mode = #tpu.pipeline_mode<synchronous>, transform_indices = @transform_2, window_bounds = array<i64: 1, 128>}, {pipeline_mode = #tpu.pipeline_mode<synchronous>, transform_indices = @transform_3, window_bounds = array<i64: 1, 128>}, {pipeline_mode = #tpu.pipeline_mode<synchronous>, transform_indices = @transform_4, window_bounds = array<i64: 1, 128>}, {pipeline_mode = #tpu.pipeline_mode<synchronous>, transform_indices = @transform_5, window_bounds = array<i64: 128, 128>}, {pipeline_mode = #tpu.pipeline_mode<synchronous>, transform_indices = @transform_6, window_bounds = array<i64: 1, 128>}, {pipeline_mode = #tpu.pipeline_mode<synchronous>, transform_indices = @transform_7, window_bounds = array<i64: 1, 128>}, {pipeline_mode = #tpu.pipeline_mode<synchronous>, transform_indices = @transform_8, window_bounds = array<i64: 1, 128>}, {pipeline_mode = #tpu.pipeline_mode<synchronous>, transform_indices = @transform_9, window_bounds = array<i64: 128, 128>}, {pipeline_mode = #tpu.pipeline_mode<synchronous>, transform_indices = @transform_10, window_bounds = array<i64: 1, 128>}, {transform_indices = @transform_11, window_bounds = array<i64: 8, 128>}]} {
    %c0 = arith.constant 0 : index
    %c0_0 = arith.constant 0 : index
    %0 = vector.load %arg1[%c0, %c0_0] : memref<8x128xf32, #tpu.memory_space<vmem>>, vector<8x128xf32>
    %c0_1 = arith.constant 0 : index
    %c0_2 = arith.constant 0 : index
    %1 = vector.load %arg2[%c0_1, %c0_2] : memref<128x128xf32, #tpu.memory_space<vmem>>, vector<128x128xf32>
    %c0_3 = arith.constant 0 : index
    %c0_4 = arith.constant 0 : index
    %2 = vector.load %arg3[%c0_3, %c0_4] : memref<1x128xf32, #tpu.memory_space<vmem>>, vector<1x128xf32>
    %cst = arith.constant dense<0.000000e+00> : vector<8x128xf32>
    %3 = tpu.matmul %0, %1, %cst {dimension_numbers = #tpu.dot_dimension_numbers<[1], [0], [0], [1], [0, 0, 1, 1], [], []>} : vector<8x128xf32>, vector<128x128xf32>, vector<8x128xf32> -> vector<8x128xf32>
    %4 = vector.broadcast %2 : vector<1x128xf32> to vector<8x128xf32>
    %5 = arith.addf %3, %4 : vector<8x128xf32>
    %cst_5 = arith.constant 0.000000e+00 : f32
    %6 = vector.broadcast %cst_5 : f32 to vector<8x128xf32>
    %7 = arith.maximumf %5, %6 : vector<8x128xf32>
    %c0_6 = arith.constant 0 : index
    %c0_7 = arith.constant 0 : index
    %8 = vector.load %arg4[%c0_6, %c0_7] : memref<1x128xf32, #tpu.memory_space<vmem>>, vector<1x128xf32>
    %c0_8 = arith.constant 0 : index
    %c0_9 = arith.constant 0 : index
    %9 = vector.load %arg5[%c0_8, %c0_9] : memref<1x128xf32, #tpu.memory_space<vmem>>, vector<1x128xf32>
    %cst_10 = arith.constant dense<0.000000e+00> : vector<8xf32>
    %10 = vector.multi_reduction <add>, %7, %cst_10 [1] : vector<8x128xf32> to vector<8xf32>
    %11 = vector.shape_cast %10 : vector<8xf32> to vector<8x1xf32>
    %cst_11 = arith.constant 6.400000e+01 : f32
    %12 = vector.broadcast %cst_11 : f32 to vector<8x1xf32>
    %13 = arith.divf %11, %12 : vector<8x1xf32>
    %14 = arith.mulf %7, %7 : vector<8x128xf32>
    %cst_12 = arith.constant dense<0.000000e+00> : vector<8xf32>
    %15 = vector.multi_reduction <add>, %14, %cst_12 [1] : vector<8x128xf32> to vector<8xf32>
    %16 = vector.shape_cast %15 : vector<8xf32> to vector<8x1xf32>
    %cst_13 = arith.constant 6.400000e+01 : f32
    %17 = vector.broadcast %cst_13 : f32 to vector<8x1xf32>
    %18 = arith.divf %16, %17 : vector<8x1xf32>
    %19 = arith.mulf %13, %13 : vector<8x1xf32>
    %20 = arith.subf %18, %19 : vector<8x1xf32>
    %21 = vector.broadcast %13 : vector<8x1xf32> to vector<8x128xf32>
    %22 = arith.subf %7, %21 : vector<8x128xf32>
    %cst_14 = arith.constant 9.99999974E-6 : f32
    %23 = vector.broadcast %cst_14 : f32 to vector<8x1xf32>
    %24 = arith.addf %20, %23 : vector<8x1xf32>
    %25 = math.rsqrt %24 : vector<8x1xf32>
    %26 = vector.broadcast %25 : vector<8x1xf32> to vector<8x128xf32>
    %27 = arith.mulf %22, %26 : vector<8x128xf32>
    %28 = vector.broadcast %8 : vector<1x128xf32> to vector<8x128xf32>
    %29 = arith.mulf %27, %28 : vector<8x128xf32>
    %30 = vector.broadcast %9 : vector<1x128xf32> to vector<8x128xf32>
    %31 = arith.addf %29, %30 : vector<8x128xf32>
    %c0_15 = arith.constant 0 : index
    %c0_16 = arith.constant 0 : index
    %32 = vector.load %arg6[%c0_15, %c0_16] : memref<128x128xf32, #tpu.memory_space<vmem>>, vector<128x128xf32>
    %c0_17 = arith.constant 0 : index
    %c0_18 = arith.constant 0 : index
    %33 = vector.load %arg7[%c0_17, %c0_18] : memref<1x128xf32, #tpu.memory_space<vmem>>, vector<1x128xf32>
    %cst_19 = arith.constant dense<0.000000e+00> : vector<8x128xf32>
    %34 = tpu.matmul %31, %32, %cst_19 {dimension_numbers = #tpu.dot_dimension_numbers<[1], [0], [0], [1], [0, 0, 1, 1], [], []>} : vector<8x128xf32>, vector<128x128xf32>, vector<8x128xf32> -> vector<8x128xf32>
    %35 = vector.broadcast %33 : vector<1x128xf32> to vector<8x128xf32>
    %36 = arith.addf %34, %35 : vector<8x128xf32>
    %cst_20 = arith.constant 0.000000e+00 : f32
    %37 = vector.broadcast %cst_20 : f32 to vector<8x128xf32>
    %38 = arith.maximumf %36, %37 : vector<8x128xf32>
    %c0_21 = arith.constant 0 : index
    %c0_22 = arith.constant 0 : index
    %39 = vector.load %arg8[%c0_21, %c0_22] : memref<1x128xf32, #tpu.memory_space<vmem>>, vector<1x128xf32>
    %c0_23 = arith.constant 0 : index
    %c0_24 = arith.constant 0 : index
    %40 = vector.load %arg9[%c0_23, %c0_24] : memref<1x128xf32, #tpu.memory_space<vmem>>, vector<1x128xf32>
    %cst_25 = arith.constant dense<0.000000e+00> : vector<8xf32>
    %41 = vector.multi_reduction <add>, %38, %cst_25 [1] : vector<8x128xf32> to vector<8xf32>
    %42 = vector.shape_cast %41 : vector<8xf32> to vector<8x1xf32>
    %cst_26 = arith.constant 6.400000e+01 : f32
    %43 = vector.broadcast %cst_26 : f32 to vector<8x1xf32>
    %44 = arith.divf %42, %43 : vector<8x1xf32>
    %45 = arith.mulf %38, %38 : vector<8x128xf32>
    %cst_27 = arith.constant dense<0.000000e+00> : vector<8xf32>
    %46 = vector.multi_reduction <add>, %45, %cst_27 [1] : vector<8x128xf32> to vector<8xf32>
    %47 = vector.shape_cast %46 : vector<8xf32> to vector<8x1xf32>
    %cst_28 = arith.constant 6.400000e+01 : f32
    %48 = vector.broadcast %cst_28 : f32 to vector<8x1xf32>
    %49 = arith.divf %47, %48 : vector<8x1xf32>
    %50 = arith.mulf %44, %44 : vector<8x1xf32>
    %51 = arith.subf %49, %50 : vector<8x1xf32>
    %52 = vector.broadcast %44 : vector<8x1xf32> to vector<8x128xf32>
    %53 = arith.subf %38, %52 : vector<8x128xf32>
    %cst_29 = arith.constant 9.99999974E-6 : f32
    %54 = vector.broadcast %cst_29 : f32 to vector<8x1xf32>
    %55 = arith.addf %51, %54 : vector<8x1xf32>
    %56 = math.rsqrt %55 : vector<8x1xf32>
    %57 = vector.broadcast %56 : vector<8x1xf32> to vector<8x128xf32>
    %58 = arith.mulf %53, %57 : vector<8x128xf32>
    %59 = vector.broadcast %39 : vector<1x128xf32> to vector<8x128xf32>
    %60 = arith.mulf %58, %59 : vector<8x128xf32>
    %61 = vector.broadcast %40 : vector<1x128xf32> to vector<8x128xf32>
    %62 = arith.addf %60, %61 : vector<8x128xf32>
    %c0_30 = arith.constant 0 : index
    %c0_31 = arith.constant 0 : index
    %63 = vector.load %arg10[%c0_30, %c0_31] : memref<128x128xf32, #tpu.memory_space<vmem>>, vector<128x128xf32>
    %c0_32 = arith.constant 0 : index
    %c0_33 = arith.constant 0 : index
    %64 = vector.load %arg11[%c0_32, %c0_33] : memref<1x128xf32, #tpu.memory_space<vmem>>, vector<1x128xf32>
    %cst_34 = arith.constant dense<0.000000e+00> : vector<8x128xf32>
    %65 = tpu.matmul %62, %63, %cst_34 {dimension_numbers = #tpu.dot_dimension_numbers<[1], [0], [0], [1], [0, 0, 1, 1], [], []>} : vector<8x128xf32>, vector<128x128xf32>, vector<8x128xf32> -> vector<8x128xf32>
    %66 = vector.broadcast %64 : vector<1x128xf32> to vector<8x128xf32>
    %67 = arith.addf %65, %66 : vector<8x128xf32>
    %c0_35 = arith.constant 0 : index
    %c0_36 = arith.constant 0 : index
    %68 = vector.load %arg12[%c0_35, %c0_36] : memref<8x128xf32, #tpu.memory_space<vmem>>, vector<8x128xf32>
    tpu.vector_store %arg12[%c0_35, %c0_36], %67 {strides = array<i32>} : memref<8x128xf32, #tpu.memory_space<vmem>>, vector<8x128xf32>,
    return
  }
  func.func @transform_0(%arg0: i32) -> (i32, i32) {
    %c0_i32 = arith.constant 0 : i32
    %c0_i32_0 = arith.constant 0 : i32
    return %arg0, %c0_i32 : i32, i32
  }
  func.func @transform_1(%arg0: i32) -> (i32, i32) {
    %c0_i32 = arith.constant 0 : i32
    %c0_i32_0 = arith.constant 0 : i32
    %c0_i32_1 = arith.constant 0 : i32
    return %c0_i32, %c0_i32_0 : i32, i32
  }
  func.func @transform_2(%arg0: i32) -> (i32, i32) {
    %c0_i32 = arith.constant 0 : i32
    %c0_i32_0 = arith.constant 0 : i32
    %c0_i32_1 = arith.constant 0 : i32
    return %c0_i32, %c0_i32_0 : i32, i32
  }
  func.func @transform_3(%arg0: i32) -> (i32, i32) {
    %c0_i32 = arith.constant 0 : i32
    %c0_i32_0 = arith.constant 0 : i32
    %c0_i32_1 = arith.constant 0 : i32
    return %c0_i32, %c0_i32_0 : i32, i32
  }
  func.func @transform_4(%arg0: i32) -> (i32, i32) {
    %c0_i32 = arith.constant 0 : i32
    %c0_i32_0 = arith.constant 0 : i32
    %c0_i32_1 = arith.constant 0 : i32
    return %c0_i32, %c0_i32_0 : i32, i32
  }
  func.func @transform_5(%arg0: i32) -> (i32, i32) {
    %c0_i32 = arith.constant 0 : i32
    %c0_i32_0 = arith.constant 0 : i32
    %c0_i32_1 = arith.constant 0 : i32
    return %c0_i32, %c0_i32_0 : i32, i32
  }
  func.func @transform_6(%arg0: i32) -> (i32, i32) {
    %c0_i32 = arith.constant 0 : i32
    %c0_i32_0 = arith.constant 0 : i32
    %c0_i32_1 = arith.constant 0 : i32
    return %c0_i32, %c0_i32_0 : i32, i32
  }
  func.func @transform_7(%arg0: i32) -> (i32, i32) {
    %c0_i32 = arith.constant 0 : i32
    %c0_i32_0 = arith.constant 0 : i32
    %c0_i32_1 = arith.constant 0 : i32
    return %c0_i32, %c0_i32_0 : i32, i32
  }
  func.func @transform_8(%arg0: i32) -> (i32, i32) {
    %c0_i32 = arith.constant 0 : i32
    %c0_i32_0 = arith.constant 0 : i32
    %c0_i32_1 = arith.constant 0 : i32
    return %c0_i32, %c0_i32_0 : i32, i32
  }
  func.func @transform_9(%arg0: i32) -> (i32, i32) {
    %c0_i32 = arith.constant 0 : i32
    %c0_i32_0 = arith.constant 0 : i32
    %c0_i32_1 = arith.constant 0 : i32
    return %c0_i32, %c0_i32_0 : i32, i32
  }
  func.func @transform_10(%arg0: i32) -> (i32, i32) {
    %c0_i32 = arith.constant 0 : i32
    %c0_i32_0 = arith.constant 0 : i32
    %c0_i32_1 = arith.constant 0 : i32
    return %c0_i32, %c0_i32_0 : i32, i32
  }
  func.func @transform_11(%arg0: i32) -> (i32, i32) {
    %c0_i32 = arith.constant 0 : i32
    %c0_i32_0 = arith.constant 0 : i32
    return %arg0, %c0_i32 : i32, i32
  }
}

</mosaic_0001>

<bundles_post_ra>
// kernel: mlp_forward.1
= control target key start
LH: loop header
LB: loop body
LE: loop exit
PB: predicated region body
PF: predicated region fallthrough
CT: control target
= control target key end

     0   :  { %s536_s0 = inlined_call_operand.vmem [shape: f32[8,128], index: 0, kind: input, shape index: {}]   ;;  %s537_s1 = inlined_call_operand.vmem [shape: f32[128,128], index: 1, kind: input, shape index: {}]   ;;  %s538_s2 = inlined_call_operand.vmem [shape: f32[1,128], index: 2, kind: input, shape index: {}]   ;;  %s539_s3 = inlined_call_operand.vmem [shape: f32[1,128], index: 3, kind: input, shape index: {}]   ;;  %s540_s4 = inlined_call_operand.vmem [shape: f32[1,128], index: 4, kind: input, shape index: {}]   ;;  %s541_s5 = inlined_call_operand.vmem [shape: f32[128,128], index: 5, kind: input, shape index: {}]   ;;  %s542_s6 = inlined_call_operand.vmem [shape: f32[1,128], index: 6, kind: input, shape index: {}]   ;;  %s543_s7 = inlined_call_operand.vmem [shape: f32[1,128], index: 7, kind: input, shape index: {}]   ;;  %s544_s8 = inlined_call_operand.vmem [shape: f32[1,128], index: 8, kind: input, shape index: {}]   ;;  %s545_s9 = inlined_call_operand.vmem [shape: f32[128,128], index: 9, kind: input, shape index: {}]   ;;  %s546_s10 = inlined_call_operand.vmem [shape: f32[1,128], index: 10, kind: input, shape index: {}]   ;;  %s547_s11 = inlined_call_operand.hbm [shape: f32[8,128], index: 11, kind: output, shape index: {}]  }
   0x1   :  { %v55_v0 = vld [vmem:[%s537_s1 + $0x78] sm:$0xff]  ;;  %v54_v1 = vld [vmem:[%s537_s1 + $0x70] sm:$0xff]  ;;  %v53_v2 = vld [vmem:[%s537_s1 + $0x68] sm:$0xff] }
   0x2   :  { %60 = vmatpush.msra.mxu0 %v55_v0  ;;  %v52_v3 = vld [vmem:[%s537_s1 + $0x60] sm:$0xff]  ;;  %v51_v4 = vld [vmem:[%s537_s1 + $0x58] sm:$0xff]  ;;  %v50_v5 = vld [vmem:[%s537_s1 + $0x50] sm:$0xff] }
   0x4   :  { %61 = vmatpush.msra.mxu0 %v54_v1 }
   0x6   :  { %62 = vmatpush.msra.mxu0 %v53_v2 }
   0x8   :  { %63 = vmatpush.msra.mxu0 %v52_v3 }
   0x9   :  { %16 = vsyncpa [#allocation3], 0  ;;  %v49_v6 = vld [vmem:[%s537_s1 + $0x48] sm:$0xff]  ;;  %v48_v7 = vld [vmem:[%s537_s1 + $0x40] sm:$0xff]  ;;  %v291_v23 = vmov 64.0   ;;  %s292_s15 = smov [#allocation2]  }
   0xa   :  { %64 = vmatpush.msra.mxu0 %v51_v4  ;;  %v47_v8 = vld [vmem:[%s537_s1 + $0x38] sm:$0xff]  ;;  %v46_v9 = vld [vmem:[%s537_s1 + $0x30] sm:$0xff]  ;;  %v45_v10 = vld [vmem:[%s537_s1 + $0x28] sm:$0xff]  ;;  %259 = vrcp.f32 %v291_v23  ;;  %s241_s17 = sshll.u32 %s547_s11, 4  ;;  %s242_s17 = int_to_ptr.hbm [resolvable:$true] %s241_s17 }
   0xb   :  { %v44_v11 = vld [vmem:[%s537_s1 + $0x20] sm:$0xff]  ;;  %v43_v12 = vld [vmem:[%s537_s1 + $0x18] sm:$0xff]  ;;  %v42_v13 = vld [vmem:[%s537_s1 + $0x10] sm:$0xff] }
   0xc   :  { %65 = vmatpush.msra.mxu0 %v50_v5  ;;  %v41_v14 = vld [vmem:[%s537_s1 + $0x8] sm:$0xff]  ;;  %v40_v15 = vld [vmem:[%s537_s1] sm:$0xff]  ;;  %v135_v22 = vld [vmem:[%s541_s5 + $0x78] sm:$0xff] }
   0xd   :  { %v39_v16 = vld [vmem:[%s536_s0] sm:$0xff]  ;;  %140 = vmatpush.msra.mxu1 %v135_v22  ;;  %v134_v24 = vld [vmem:[%s541_s5 + $0x70] sm:$0xff]  ;;  %v133_v25 = vld [vmem:[%s541_s5 + $0x68] sm:$0xff]  ;;  %s239_s0 = sshll.u32 %s292_s15, 4  ;;  %s240_s0 = int_to_ptr.vmem [resolvable:$true] %s239_s0 }
   0xe   :  { %66 = vmatpush.msra.mxu0 %v49_v6  ;;  %v252_v17 = vld [vmem:[%s538_s2] ss:$0 sm:$0xff]  ;;  %v131_v28 = vld [vmem:[%s541_s5 + $0x58] sm:$0xff]  ;;  %v130_v29 = vld [vmem:[%s541_s5 + $0x50] sm:$0xff] }
   0xf   :  { %141 = vmatpush.msra.mxu1 %v134_v24  ;;  %v132_v26 = vld [vmem:[%s541_s5 + $0x60] sm:$0xff]  ;;  %v129_v31 = vld [vmem:[%s541_s5 + $0x48] sm:$0xff]  ;;  %v127_v34 = vld [vmem:[%s541_s5 + $0x38] sm:$0xff] }
  0x10   :  { %67 = vmatpush.msra.mxu0 %v48_v7  ;;  %v260_v27 = vpop.eup %259  ;;  %v128_v32 = vld [vmem:[%s541_s5 + $0x40] sm:$0xff]  ;;  %v126_v35 = vld [vmem:[%s541_s5 + $0x30] sm:$0xff]  ;;  %v125_v37 = vld [vmem:[%s541_s5 + $0x28] sm:$0xff] }
  0x11   :  { %142 = vmatpush.msra.mxu1 %v133_v25  ;;  %v86_v30 = vmul.f32 64.0, %v260_v27  ;;  %v124_v38 = vld [vmem:[%s541_s5 + $0x20] sm:$0xff]  ;;  %v123_v39 = vld [vmem:[%s541_s5 + $0x18] sm:$0xff]  ;;  %vm90_vm0 = vweird.f32 %v260_v27  ;;  %v122_v41 = vld [vmem:[%s541_s5 + $0x10] sm:$0xff] }
  0x12   :  { %68 = vmatpush.msra.mxu0 %v47_v8  ;;  %v121_v43 = vld [vmem:[%s541_s5 + $0x8] sm:$0xff]  ;;  %v120_v45 = vld [vmem:[%s541_s5] sm:$0xff]  ;;  %v208_v6 = vld [vmem:[%s545_s9 + $0x78] sm:$0xff] }
  0x13   :  { %143 = vmatpush.msra.mxu1 %v132_v26  ;;  %v87_v33 = vsub.f32 1.0, %v86_v30  ;;  %v253_v59 = vld [vmem:[%s539_s3] ss:$0 sm:$0xff]  ;;  %213 = vmatpush.msra.mxu2 %v208_v6  ;;  %v207_v7 = vld [vmem:[%s545_s9 + $0x70] sm:$0xff]  ;;  %v206_v8 = vld [vmem:[%s545_s9 + $0x68] sm:$0xff] }
  0x14   :  { %69 = vmatpush.msra.mxu0 %v46_v9  ;;  %v254_v62 = vld [vmem:[%s540_s4] ss:$0 sm:$0xff] }
  0x15   :  { %144 = vmatpush.msra.mxu1 %v131_v28  ;;  %v88_v36 = vmul.f32 %v260_v27, %v87_v33  ;;  %v255_v1 = vld [vmem:[%s542_s6] ss:$0 sm:$0xff]  ;;  %214 = vmatpush.msra.mxu2 %v207_v7 }
  0x16   :  { %70 = vmatpush.msra.mxu0 %v45_v10  ;;  %v205_v9 = vld [vmem:[%s545_s9 + $0x60] sm:$0xff]  ;;  %v204_v10 = vld [vmem:[%s545_s9 + $0x58] sm:$0xff] }
  0x17   :  { %145 = vmatpush.msra.mxu1 %v130_v29  ;;  %v89_v40 = vadd.f32 %v260_v27, %v88_v36  ;;  %215 = vmatpush.msra.mxu2 %v206_v8  ;;  %v193_v22 = vld [vmem:[%s545_s9] sm:$0xff] }
  0x18   :  { %71 = vmatpush.msra.mxu0 %v44_v11  ;;  %v203_v11 = vld [vmem:[%s545_s9 + $0x50] sm:$0xff]  ;;  %v256_v36 = vld [vmem:[%s543_s7] ss:$0 sm:$0xff] }
  0x19   :  { %146 = vmatpush.msra.mxu1 %v129_v31  ;;  %v457_v44 = vsel %vm90_vm0, %v260_v27, %v89_v40  ;;  %216 = vmatpush.msra.mxu2 %v205_v9 }
  0x1a   :  { %72 = vmatpush.msra.mxu0 %v43_v12  ;;  %v202_v12 = vld [vmem:[%s545_s9 + $0x48] sm:$0xff] }
  0x1b   :  { %147 = vmatpush.msra.mxu1 %v128_v32  ;;  %217 = vmatpush.msra.mxu2 %v204_v10 }
  0x1c   :  { %73 = vmatpush.msra.mxu0 %v42_v13  ;;  %v201_v13 = vld [vmem:[%s545_s9 + $0x40] sm:$0xff] }
  0x1d   :  { %148 = vmatpush.msra.mxu1 %v127_v34  ;;  %218 = vmatpush.msra.mxu2 %v203_v11 }
  0x1e   :  { %74 = vmatpush.msra.mxu0 %v41_v14  ;;  %v200_v14 = vld [vmem:[%s545_s9 + $0x38] sm:$0xff] }
  0x1f   :  { %149 = vmatpush.msra.mxu1 %v126_v35  ;;  %219 = vmatpush.msra.mxu2 %v202_v12 }
  0x20   :  { %75 = vmatpush.msra.mxu0 %v40_v15  ;;  %v199_v15 = vld [vmem:[%s545_s9 + $0x30] sm:$0xff] }
  0x21   :  { %76 = vmatmul.f32.vlgmr.msra.gmra.mxu0 %v39_v16  ;;  %150 = vmatpush.msra.mxu1 %v125_v37  ;;  %v198_v16 = vld [vmem:[%s545_s9 + $0x28] sm:$0xff] }
  0x22   :  { %220 = vmatpush.msra.mxu2 %v201_v13 }
  0x23   :  { %151 = vmatpush.msra.mxu1 %v124_v38 }
  0x24   :  { %221 = vmatpush.msra.mxu2 %v200_v14 }
  0x25   :  { %152 = vmatpush.msra.mxu1 %v123_v39  ;;  %v257_v39 = vld [vmem:[%s544_s8] ss:$0 sm:$0xff] }
  0x26   :  { %222 = vmatpush.msra.mxu2 %v199_v15 }
  0x27   :  { %153 = vmatpush.msra.mxu1 %v122_v41 }
  0x28   :  { %223 = vmatpush.msra.mxu2 %v198_v16 }
  0x29   :  { %154 = vmatpush.msra.mxu1 %v121_v43 }
  0x2b   :  { %155 = vmatpush.msra.mxu1 %v120_v45 }
  0x9e   :  { %v77_v18 = vpop.f32.mrf.mxu0 }
  0x9f   :  { %v78_v19 = vadd.f32 %v252_v17, %v77_v18  ;;  %v197_v17 = vld [vmem:[%s545_s9 + $0x20] sm:$0xff]  ;;  %v196_v18 = vld [vmem:[%s545_s9 + $0x18] sm:$0xff] }
  0xa0   :  { %224 = vmatpush.msra.mxu2 %v197_v17 }
  0xa1   :  { %v407_v20 = vmax.f32 %v78_v19, 0.0  ;;  %v195_v19 = vld [vmem:[%s545_s9 + $0x10] sm:$0xff] }
  0xa2   :  { %225 = vmatpush.msra.mxu2 %v196_v18 }
  0xa3   :  { %83 = vadd.xlane.f32.xlu0 %v407_v20  ;;  %v93_v21 = vmul.f32 %v407_v20, %v407_v20 }
  0xa4   :  { %226 = vmatpush.msra.mxu2 %v195_v19 }
  0xab   :  { %94 = vadd.xlane.f32.xlu0 %v93_v21  ;;  %v194_v21 = vld [vmem:[%s545_s9 + $0x8] sm:$0xff] }
  0xac   :  { %227 = vmatpush.msra.mxu2 %v194_v21 }
  0xae   :  { %228 = vmatpush.msra.mxu2 %v193_v22 }
 0x116   :  { %v84_v42 = vpop.xlane.xlu0 %83 }
 0x117   :  { %v92_v46 = vmul.f32 %v457_v44, %v84_v42  ;;  %v258_v42 = vld [vmem:[%s546_s10] ss:$0 sm:$0xff] }
 0x119   :  { %v97_v48 = vmul.f32 %v92_v46, %v92_v46  ;;  %v99_v58 = vsub.f32 %v407_v20, %v92_v46 }
 0x11e   :  { %v95_v47 = vpop.xlane.xlu0 %94 }
 0x11f   :  { %v96_v49 = vmul.f32 %v95_v47, %v457_v44 }
 0x121   :  { %v98_v50 = vsub.f32 %v96_v49, %v97_v48 }
 0x123   :  { %v100_v51 = vadd.f32 1e-05, %v98_v50 }
 0x125   :  { %261 = vrsqrt.f32 %v100_v51  ;;  %vm107_vm2 = vweird.f32 %v100_v51 }
 0x12b   :  { %v262_v52 = vpop.eup %261 }
 0x12c   :  { %v102_v53 = vmul.f32 %v262_v52, %v100_v51  ;;  %vm108_vm1 = vweird.f32 %v262_v52 }
 0x12d   :  { %vm109_vm3 = vmor %vm107_vm2, %vm108_vm1 }
 0x12e   :  { %v103_v54 = vmul.f32 %v262_v52, %v102_v53 }
 0x130   :  { %v104_v55 = vmul.f32 0.5, %v103_v54 }
 0x132   :  { %v105_v56 = vsub.f32 1.5, %v104_v55 }
 0x134   :  { %v106_v57 = vmul.f32 %v262_v52, %v105_v56 }
 0x136   :  { %v110_v60 = vsel %vm109_vm3, %v262_v52, %v106_v57 }
 0x137   :  { %v111_v61 = vmul.f32 %v110_v60, %v99_v58 }
 0x139   :  { %v115_v63 = vmul.f32 %v253_v59, %v111_v61 }
 0x13b   :  { %v119_v0 = vadd.f32 %v254_v62, %v115_v63 }
 0x13d   :  { %156 = vmatmul.f32.vlgmr.msra.gmra.mxu1 %v119_v0 }
 0x1ba   :  { %v157_v2 = vpop.f32.mrf.mxu1 }
 0x1bb   :  { %v158_v3 = vadd.f32 %v255_v1, %v157_v2 }
 0x1bd   :  { %v160_v4 = vmax.f32 %v158_v3, 0.0 }
 0x1bf   :  { %163 = vadd.xlane.f32.xlu1 %v160_v4  ;;  %v166_v5 = vmul.f32 %v160_v4, %v160_v4 }
 0x1c7   :  { %167 = vadd.xlane.f32.xlu1 %v166_v5 }
 0x232   :  { %v164_v20 = vpop.xlane.xlu1 %163 }
 0x233   :  { %v165_v23 = vmul.f32 %v164_v20, %v457_v44 }
 0x235   :  { %v170_v25 = vmul.f32 %v165_v23, %v165_v23  ;;  %v172_v35 = vsub.f32 %v160_v4, %v165_v23 }
 0x23a   :  { %v168_v24 = vpop.xlane.xlu1 %167 }
 0x23b   :  { %v169_v26 = vmul.f32 %v168_v24, %v457_v44 }
 0x23d   :  { %v171_v27 = vsub.f32 %v169_v26, %v170_v25 }
 0x23f   :  { %v173_v28 = vadd.f32 1e-05, %v171_v27 }
 0x241   :  { %263 = vrsqrt.f32 %v173_v28  ;;  %vm180_vm5 = vweird.f32 %v173_v28 }
 0x247   :  { %v264_v29 = vpop.eup %263 }
 0x248   :  { %v175_v30 = vmul.f32 %v264_v29, %v173_v28  ;;  %vm181_vm4 = vweird.f32 %v264_v29 }
 0x249   :  { %vm182_vm6 = vmor %vm180_vm5, %vm181_vm4 }
 0x24a   :  { %v176_v31 = vmul.f32 %v264_v29, %v175_v30 }
 0x24c   :  { %v177_v32 = vmul.f32 0.5, %v176_v31 }
 0x24e   :  { %v178_v33 = vsub.f32 1.5, %v177_v32 }
 0x250   :  { %v179_v34 = vmul.f32 %v264_v29, %v178_v33 }
 0x252   :  { %v183_v37 = vsel %vm182_vm6, %v264_v29, %v179_v34 }
 0x253   :  { %v184_v38 = vmul.f32 %v183_v37, %v172_v35 }
 0x255   :  { %v188_v40 = vmul.f32 %v256_v36, %v184_v38 }
 0x257   :  { %v192_v41 = vadd.f32 %v257_v39, %v188_v40 }
 0x259   :  { %229 = vmatmul.f32.vlgmr.msra.gmra.mxu2 %v192_v41 }
 0x2dc   :  { %v230_v43 = vpop.f32.mrf.mxu2 }
 0x2dd   :  { %v231_v44 = vadd.f32 %v258_v42, %v230_v43 }
 0x2df   :  { %233 = vst [vmem:[#allocation2] sm:$0xff] %v231_v44 }
 0x2e0   :  { %244 = dma.vmem_to_hbm [thread:$0]  %s240_s0, 128, %s242_s17, [#allocation3]  }
 0x2e1   :  { %289 = dma.done.wait [#allocation3], 128  }
 0x2e2   :  { %290 = vsyncadd [#allocation3], 4294967168 }
 0x2e3   :  { %249 = vsyncpa [#allocation3], 1 }

</bundles_post_ra>
